<compile_context>
chip_gen: v5e
topology: v5e:2x2
jax: 0.10.0
libtpu: 0.0.40
codegen_flags: <defaults>
</compile_context>

<pallas_src>
import jax
import jax.numpy as jnp
from jax.experimental import pallas as pl
from jax.experimental.pallas import tpu as pltpu


def _round_up(x, m):
    return ((x + m - 1) // m) * m


def _largest_divisor_multiple(total, unit, cap):
    """Largest multiple of `unit` that divides `total` and is <= cap, or None."""
    best = None
    d = unit
    limit = min(total, cap)
    while d <= limit:
        if total % d == 0:
            best = d
        d += unit
    return best


def fold_normalization_into_linear(mean, std, w, b, spatial, *, weight_dtype=jnp.bfloat16):
    """One-time (cached) preprocessing: fold (x - mean)/std into the linear layer.

      (x - mean)/std @ W + b  ==  x @ (W * inv_std_K)  +  (b - (mean*inv_std)_K @ W)

    The fold is done in fp32; only the final folded weight is cast to bf16.
    mean/std: [C];  w: [C*spatial, M];  b: [M].
    """
    inv_std = (1.0 / std).astype(jnp.float32)                       # [C]  (multiply, not divide)
    scale_k = jnp.repeat(inv_std, spatial)                          # [K]
    shift_k = jnp.repeat(mean.astype(jnp.float32) * inv_std, spatial)  # [K]
    w32 = w.astype(jnp.float32)
    w_fold = (w32 * scale_k[:, None]).astype(weight_dtype)          # [K, M] bf16
    b_fold = b.astype(jnp.float32) - shift_k @ w32                  # [M]   fp32
    return w_fold, b_fold


def _fused_matmul_kernel(x_ref, w_ref, b_ref, o_ref):
    """o = x @ w + b  (normalization pre-folded into w/b outside the kernel).

    Grid: (N tiles, M tiles, K tiles), K last (reduction).  The fp32 output block is
    VMEM-resident across k (constant (i, j) block index), so it doubles as the
    accumulator; the bias is folded into its k==0 init.
    """
    k = pl.program_id(2)

    @pl.when(k == 0)
    def _():
        o_ref[...] = jnp.broadcast_to(b_ref[...], o_ref.shape).astype(o_ref.dtype)

    # Pure MXU work: one (tm, tk) x (tk, tn) bf16 tile matmul, fp32 accumulation.
    o_ref[...] += jnp.dot(x_ref[...], w_ref[...], preferred_element_type=jnp.float32)


def normalized_linear_forward(x, w_fold, b_fold, *, tm=256, tn=512, tk=2048):
    """Forward of NormalizedModel with a (pre-folded) linear inner model.

    x: [N, C, H, W];  w_fold: [K, M] (bf16);  b_fold: [M] (fp32).
    Returns: [N, M] float32.
    """
    N = x.shape[0]
    K, M = w_fold.shape
    xf = x.reshape(N, -1)
    assert xf.shape[1] == K, "flattened input size must match folded weight rows"
    xf = xf.astype(w_fold.dtype)  # bf16 activations at the kernel boundary

    # ---- Tile / padding choices -------------------------------------------------
    # N (sublane dim of x & output): pad to 8, tile = min(tm, N_p).
    n_p8 = _round_up(N, 8)
    tm_eff = _round_up(min(max(tm, 8), n_p8), 8)
    N_p = _round_up(n_p8, tm_eff)

    # M (lane dim of W / bias / output): full-dim block when small (no 128 padding).
    if M < 128:
        tn_eff, M_p = M, M
    else:
        cand = _largest_divisor_multiple(M, 128, max(tn, 128))
        if cand is not None:
            tn_eff, M_p = cand, M
        else:
            tn_eff = min(_round_up(max(tn, 128), 128), _round_up(M, 128))
            M_p = _round_up(M, tn_eff)

    # K (reduction, innermost grid axis): whole-K single step when it fits,
    # otherwise a 128-multiple that divides K (so x needs no per-call K padding).
    if K <= tk:
        tk_eff, K_p = K, K
    else:
        cand = _largest_divisor_multiple(K, 128, tk)
        if cand is not None:
            tk_eff, K_p = cand, K
        else:
            tk_eff = max(128, (min(tk, K) // 128) * 128)
            K_p = _round_up(K, tk_eff)

    # ---- Padding (no-ops for the common/validation shapes) ----------------------
    if (N_p, K_p) != (N, K):
        x_p = jnp.zeros((N_p, K_p), xf.dtype).at[:N, :K].set(xf)
    else:
        x_p = xf
    if (K_p, M_p) != (K, M):
        # NOTE: for static weights, pre-pad once in the init step instead.
        w_p = jnp.zeros((K_p, M_p), w_fold.dtype).at[:K, :M].set(w_fold)
        b_p = jnp.zeros((1, M_p), jnp.float32).at[0, :M].set(b_fold)
    else:
        w_p = w_fold
        b_p = b_fold.reshape(1, M)

    grid = (N_p // tm_eff, M_p // tn_eff, K_p // tk_eff)

    # ---- VMEM budget: derive from the actual chip's capacity --------------------
    try:
        vmem_cap = int(pltpu.get_tpu_info().vmem_capacity_bytes)
    except Exception:
        vmem_cap = 64 << 20  # conservative (v7x per-TC)
    xb = jnp.dtype(x_p.dtype).itemsize
    wb = jnp.dtype(w_p.dtype).itemsize
    tile_bytes = (
        2 * tm_eff * tk_eff * xb      # double-buffered x tile
        + 2 * tk_eff * tn_eff * wb    # double-buffered W tile
        + 2 * 1 * tn_eff * 4          # bias tile
        + 2 * tm_eff * tn_eff * 4     # fp32 output block (resident across k)
    )
    vmem_limit = int(min(max(2 * tile_bytes, 16 << 20), vmem_cap // 2))

    out_p = pl.pallas_call(
        _fused_matmul_kernel,
        out_shape=jax.ShapeDtypeStruct((N_p, M_p), jnp.float32),
        grid_spec=pltpu.PrefetchScalarGridSpec(
            num_scalar_prefetch=0,
            grid=grid,
            in_specs=[
                pl.BlockSpec((tm_eff, tk_eff), lambda i, j, k: (i, k)),
                pl.BlockSpec((tk_eff, tn_eff), lambda i, j, k: (k, j)),
                pl.BlockSpec((1, tn_eff), lambda i, j, k: (0, j)),
            ],
            out_specs=pl.BlockSpec((tm_eff, tn_eff), lambda i, j, k: (i, j)),
        ),
        compiler_params=pltpu.CompilerParams(
            dimension_semantics=("parallel", "parallel", "arbitrary"),
            vmem_limit_bytes=vmem_limit,
        ),
    )(x_p, w_p, b_p)

    if (N_p, M_p) != (N, M):
        out_p = out_p[:N, :M]
    return out_p


if __name__ == "__main__":
    # Small deterministic shapes consistent with the module's forward.
    N, C, H, W = 2, 4, 16, 16
    NUM_CLASSES = 16
    K = C * H * W

    key = jax.random.PRNGKey(0)
    kx, kw, kb = jax.random.split(key, 3)

    x = jax.random.normal(kx, (N, C, H, W), dtype=jnp.float32)
    # Deterministic per-channel normalization constants (ImageNet-like + filler).
    mean = jnp.array([0.485, 0.456, 0.406, 0.5], dtype=jnp.float32)
    std = jnp.array([0.229, 0.224, 0.225, 0.25], dtype=jnp.float32)
    # Deterministic inner-model (linear classifier) parameters.
    w = jax.random.normal(kw, (K, NUM_CLASSES), dtype=jnp.float32) * 0.02
    b = jax.random.normal(kb, (NUM_CLASSES,), dtype=jnp.float32) * 0.1

    # One-time fold of the normalization into the linear layer (out of the hot path).
    w_fold, b_fold = fold_normalization_into_linear(mean, std, w, b, H * W)
    w_fold, b_fold = jax.block_until_ready((w_fold, b_fold))

    out = normalized_linear_forward(x, w_fold, b_fold)
    out = jax.block_until_ready(out)

    # Reference 1: same bf16-weight path in pure JAX (tight tolerance).
    ref_bf16 = (
        jnp.dot(x.reshape(N, K).astype(jnp.bfloat16), w_fold,
                preferred_element_type=jnp.float32)
        + b_fold[None, :]
    )
    # Reference 2: exact fp32 module semantics (loose tolerance; weights are bf16).
    xn = (x - mean[None, :, None, None]) / std[None, :, None, None]
    ref_f32 = xn.reshape(N, K) @ w + b[None, :]

    assert out.shape == (N, NUM_CLASSES)
    assert jnp.allclose(out, ref_bf16, atol=2e-3, rtol=2e-3)
    assert jnp.allclose(out, ref_f32, atol=5e-2, rtol=5e-2)

    print("KERNEL_OK")
</pallas_src>

<mosaic_0001>
module attributes {stable_mosaic.version = 11 : i64} {
  func.func @_fused_matmul_kernel(%arg0: i32, %arg1: i32, %arg2: i32, %arg3: memref<8x1024xbf16, #tpu.memory_space<vmem>>, %arg4: memref<1024x16xbf16, #tpu.memory_space<vmem>>, %arg5: memref<1x16xf32, #tpu.memory_space<vmem>>, %arg6: memref<8x16xf32, #tpu.memory_space<vmem>>) attributes {dimension_semantics = [#tpu.dimension_semantics<parallel>, #tpu.dimension_semantics<parallel>, #tpu.dimension_semantics<arbitrary>], iteration_bounds = array<i64: 1, 1, 1>, scalar_prefetch = 0 : i64, scratch_operands = 0 : i64, tpu.core_type = #tpu.core_type<tc>, window_params = [{transform_indices = @transform_0, window_bounds = array<i64: 8, 1024>}, {transform_indices = @transform_1, window_bounds = array<i64: 1024, 16>}, {transform_indices = @transform_2, window_bounds = array<i64: 1, 16>}, {transform_indices = @transform_3, window_bounds = array<i64: 8, 16>}]} {
    %c0_i32 = arith.constant 0 : i32
    %0 = arith.cmpi eq, %arg2, %c0_i32 : i32
    %1 = arith.extui %0 : i1 to i32
    %c0_i32_0 = arith.constant 0 : i32
    %2 = arith.cmpi ne, %1, %c0_i32_0 : i32
    scf.if %2 {
      %c0_8 = arith.constant 0 : index
      %c0_9 = arith.constant 0 : index
      %9 = vector.load %arg5[%c0_8, %c0_9] : memref<1x16xf32, #tpu.memory_space<vmem>>, vector<1x16xf32>
      %10 = vector.shape_cast %9 : vector<1x16xf32> to vector<1x16xf32>
      %11 = vector.broadcast %10 : vector<1x16xf32> to vector<8x16xf32>
      %c0_10 = arith.constant 0 : index
      %c0_11 = arith.constant 0 : index
      %12 = vector.load %arg6[%c0_10, %c0_11] : memref<8x16xf32, #tpu.memory_space<vmem>>, vector<8x16xf32>
      tpu.vector_store %arg6[%c0_10, %c0_11], %11 {strides = array<i32>} : memref<8x16xf32, #tpu.memory_space<vmem>>, vector<8x16xf32>,
    } else {
    }
    %c0 = arith.constant 0 : index
    %c0_1 = arith.constant 0 : index
    %3 = vector.load %arg6[%c0, %c0_1] : memref<8x16xf32, #tpu.memory_space<vmem>>, vector<8x16xf32>
    %c0_2 = arith.constant 0 : index
    %c0_3 = arith.constant 0 : index
    %4 = vector.load %arg3[%c0_2, %c0_3] : memref<8x1024xbf16, #tpu.memory_space<vmem>>, vector<8x1024xbf16>
    %c0_4 = arith.constant 0 : index
    %c0_5 = arith.constant 0 : index
    %5 = vector.load %arg4[%c0_4, %c0_5] : memref<1024x16xbf16, #tpu.memory_space<vmem>>, vector<1024x16xbf16>
    %cst = arith.constant dense<0.000000e+00> : vector<8x16xf32>
    %6 = tpu.matmul %4, %5, %cst {dimension_numbers = #tpu.dot_dimension_numbers<[1], [0], [0], [1], [0, 0, 1, 1], [], []>} : vector<8x1024xbf16>, vector<1024x16xbf16>, vector<8x16xf32> -> vector<8x16xf32>
    %7 = arith.addf %3, %6 : vector<8x16xf32>
    %c0_6 = arith.constant 0 : index
    %c0_7 = arith.constant 0 : index
    %8 = vector.load %arg6[%c0_6, %c0_7] : memref<8x16xf32, #tpu.memory_space<vmem>>, vector<8x16xf32>
    tpu.vector_store %arg6[%c0_6, %c0_7], %7 {strides = array<i32>} : memref<8x16xf32, #tpu.memory_space<vmem>>, vector<8x16xf32>,
    return
  }
  func.func @transform_0(%arg0: i32, %arg1: i32, %arg2: i32) -> (i32, i32) {
    %c0_i32 = arith.constant 0 : i32
    return %arg0, %arg2 : i32, i32
  }
  func.func @transform_1(%arg0: i32, %arg1: i32, %arg2: i32) -> (i32, i32) {
    %c0_i32 = arith.constant 0 : i32
    return %arg2, %arg1 : i32, i32
  }
  func.func @transform_2(%arg0: i32, %arg1: i32, %arg2: i32) -> (i32, i32) {
    %c0_i32 = arith.constant 0 : i32
    %c0_i32_0 = arith.constant 0 : i32
    return %c0_i32, %arg1 : i32, i32
  }
  func.func @transform_3(%arg0: i32, %arg1: i32, %arg2: i32) -> (i32, i32) {
    %c0_i32 = arith.constant 0 : i32
    return %arg0, %arg1 : i32, i32
  }
}

</mosaic_0001>

<bundles_post_ra>
// kernel: tpu_custom_call.1
= control target key start
LH: loop header
LB: loop body
LE: loop exit
PB: predicated region body
PF: predicated region fallthrough
CT: control target
= control target key end

     0   :  { %s1274_s0 = inlined_call_operand.vmem [shape: bf16[8,1024], index: 0, kind: input, shape index: {}]   ;;  %s1275_s1 = inlined_call_operand.vmem [shape: bf16[1024,16], index: 1, kind: input, shape index: {}]   ;;  %s1276_s2 = inlined_call_operand.vmem [shape: f32[1,16], index: 2, kind: input, shape index: {}]   ;;  %s1277_s3 = inlined_call_operand.hbm [shape: f32[8,16], index: 3, kind: output, shape index: {}]  }
   0x1   :  { %v956_v0 = vld [vmem:[%s1275_s1 + $0x38] sm:$0xff]  ;;  %v955_v4 = vld [vmem:[%s1275_s1 + $0x30] sm:$0xff]  ;;  %v954_v8 = vld [vmem:[%s1275_s1 + $0x28] sm:$0xff] }
   0x2   :  { %v964_v1 = vld [vmem:[%s1275_s1 + $0x78] sm:$0xff]  ;;  %570 = vmatpush.bf16.msra.mxu0 %v956_v0  ;;  %v963_v5 = vld [vmem:[%s1275_s1 + $0x70] sm:$0xff]  ;;  %v962_v9 = vld [vmem:[%s1275_s1 + $0x68] sm:$0xff] }
   0x3   :  { %v972_v2 = vld [vmem:[%s1275_s1 + $0xb8] sm:$0xff]  ;;  %583 = vmatpush.bf16.msra.mxu1 %v964_v1  ;;  %v971_v6 = vld [vmem:[%s1275_s1 + $0xb0] sm:$0xff]  ;;  %v970_v10 = vld [vmem:[%s1275_s1 + $0xa8] sm:$0xff] }
   0x4   :  { %v980_v3 = vld [vmem:[%s1275_s1 + $0xf8] sm:$0xff]  ;;  %596 = vmatpush.bf16.msra.mxu2 %v972_v2  ;;  %v979_v7 = vld [vmem:[%s1275_s1 + $0xf0] sm:$0xff]  ;;  %v978_v11 = vld [vmem:[%s1275_s1 + $0xe8] sm:$0xff] }
   0x5   :  { %609 = vmatpush.bf16.msra.mxu3 %v980_v3  ;;  %v953_v12 = vld [vmem:[%s1275_s1 + $0x20] sm:$0xff]  ;;  %v952_v16 = vld [vmem:[%s1275_s1 + $0x18] sm:$0xff]  ;;  %v951_v20 = vld [vmem:[%s1275_s1 + $0x10] sm:$0xff] }
   0x6   :  { %571 = vmatpush.bf16.msra.mxu0 %v955_v4  ;;  %v961_v13 = vld [vmem:[%s1275_s1 + $0x60] sm:$0xff]  ;;  %v960_v17 = vld [vmem:[%s1275_s1 + $0x58] sm:$0xff]  ;;  %v959_v21 = vld [vmem:[%s1275_s1 + $0x50] sm:$0xff] }
   0x7   :  { %584 = vmatpush.bf16.msra.mxu1 %v963_v5  ;;  %v969_v14 = vld [vmem:[%s1275_s1 + $0xa0] sm:$0xff]  ;;  %v968_v18 = vld [vmem:[%s1275_s1 + $0x98] sm:$0xff] }
   0x8   :  { %597 = vmatpush.bf16.msra.mxu2 %v971_v6  ;;  %v977_v15 = vld [vmem:[%s1275_s1 + $0xe0] sm:$0xff]  ;;  %v976_v19 = vld [vmem:[%s1275_s1 + $0xd8] sm:$0xff] }
   0x9   :  { %610 = vmatpush.bf16.msra.mxu3 %v979_v7 }
   0xa   :  { %572 = vmatpush.bf16.msra.mxu0 %v954_v8 }
   0xb   :  { %585 = vmatpush.bf16.msra.mxu1 %v962_v9 }
   0xc   :  { %598 = vmatpush.bf16.msra.mxu2 %v970_v10 }
   0xd   :  { %611 = vmatpush.bf16.msra.mxu3 %v978_v11 }
   0xe   :  { %573 = vmatpush.bf16.msra.mxu0 %v953_v12 }
   0xf   :  { %586 = vmatpush.bf16.msra.mxu1 %v961_v13 }
  0x10   :  { %599 = vmatpush.bf16.msra.mxu2 %v969_v14 }
  0x11   :  { %612 = vmatpush.bf16.msra.mxu3 %v977_v15 }
  0x12   :  { %574 = vmatpush.bf16.msra.mxu0 %v952_v16 }
  0x13   :  { %587 = vmatpush.bf16.msra.mxu1 %v960_v17 }
  0x14   :  { %8 = vsyncpa [#allocation3], 0  ;;  %600 = vmatpush.bf16.msra.mxu2 %v968_v18  ;;  %v967_v22 = vld [vmem:[%s1275_s1 + $0x90] sm:$0xff]  ;;  %v950_v24 = vld [vmem:[%s1275_s1 + $0x8] sm:$0xff]  ;;  %vm23_vm0 = vcmask 130048   ;;  %s684_s16 = sshll.u32 %s1277_s3, 4  ;;  %s685_s16 = int_to_ptr.hbm [resolvable:$true] %s684_s16 }
  0x15   :  { %613 = vmatpush.bf16.msra.mxu3 %v976_v19  ;;  %v975_v23 = vld [vmem:[%s1275_s1 + $0xd0] sm:$0xff]  ;;  %v958_v25 = vld [vmem:[%s1275_s1 + $0x48] sm:$0xff]  ;;  %v26_v29 = vld [vmem:[%s1274_s0] sm:$0xff] }
  0x16   :  { %575 = vmatpush.bf16.msra.mxu0 %v951_v20  ;;  %v966_v26 = vld [vmem:[%s1275_s1 + $0x88] sm:$0xff]  ;;  %v949_v30 = vld [vmem:[%s1275_s1] sm:$0xff]  ;;  %v162_v36 = vunpack.c.l.b16 %v26_v29  ;;  %v163_v37 = vunpack.c.h.b16 %v26_v29  ;;  %v988_v38 = vld [vmem:[%s1275_s1 + $0x138] sm:$0xff] }
  0x17   :  { %588 = vmatpush.bf16.msra.mxu1 %v959_v21  ;;  %v974_v27 = vld [vmem:[%s1275_s1 + $0xc8] sm:$0xff]  ;;  %v957_v31 = vld [vmem:[%s1275_s1 + $0x40] sm:$0xff]  ;;  %v996_v39 = vld [vmem:[%s1275_s1 + $0x178] sm:$0xff] }
  0x18   :  { %601 = vmatpush.bf16.msra.mxu2 %v967_v22  ;;  %v27_v28 = vld [vmem:[%s1274_s0 + $0x8] sm:$0xff]  ;;  %v965_v34 = vld [vmem:[%s1275_s1 + $0x80] sm:$0xff]  ;;  %v1004_v40 = vld [vmem:[%s1275_s1 + $0x1b8] sm:$0xff]  ;;  %v170_v44 = vpack.c.b16 %v162_v36, %v162_v36  ;;  %v171_v45 = vpack.c.b16 %v163_v37, %v163_v37 }
  0x19   :  { %614 = vmatpush.bf16.msra.mxu3 %v975_v23  ;;  %v164_v32 = vunpack.c.l.b16 %v27_v28  ;;  %v165_v33 = vunpack.c.h.b16 %v27_v28  ;;  %v973_v35 = vld [vmem:[%s1275_s1 + $0xc0] sm:$0xff]  ;;  %v1012_v41 = vld [vmem:[%s1275_s1 + $0x1f8] sm:$0xff]  ;;  %v987_v46 = vld [vmem:[%s1275_s1 + $0x130] sm:$0xff] }
  0x1a   :  { %576 = vmatpush.bf16.msra.mxu0 %v950_v24  ;;  %v995_v47 = vld [vmem:[%s1275_s1 + $0x170] sm:$0xff]  ;;  %v986_v50 = vld [vmem:[%s1275_s1 + $0x128] sm:$0xff]  ;;  %v985_v54 = vld [vmem:[%s1275_s1 + $0x120] sm:$0xff] }
  0x1b   :  { %589 = vmatpush.bf16.msra.mxu1 %v958_v25  ;;  %v172_v42 = vpack.c.b16 %v164_v32, %v164_v32  ;;  %v173_v43 = vpack.c.b16 %v165_v33, %v165_v33  ;;  %v1003_v48 = vld [vmem:[%s1275_s1 + $0x1b0] sm:$0xff]  ;;  %v994_v51 = vld [vmem:[%s1275_s1 + $0x168] sm:$0xff]  ;;  %v993_v55 = vld [vmem:[%s1275_s1 + $0x160] sm:$0xff] }
  0x1c   :  { %602 = vmatpush.bf16.msra.mxu2 %v966_v26  ;;  %v1011_v49 = vld [vmem:[%s1275_s1 + $0x1f0] sm:$0xff]  ;;  %v1002_v52 = vld [vmem:[%s1275_s1 + $0x1a8] sm:$0xff]  ;;  %v1001_v56 = vld [vmem:[%s1275_s1 + $0x1a0] sm:$0xff] }
  0x1d   :  { %615 = vmatpush.bf16.msra.mxu3 %v974_v27  ;;  %v1010_v53 = vld [vmem:[%s1275_s1 + $0x1e8] sm:$0xff]  ;;  %v1009_v57 = vld [vmem:[%s1275_s1 + $0x1e0] sm:$0xff]  ;;  %v984_v58 = vld [vmem:[%s1275_s1 + $0x118] sm:$0xff] }
  0x1e   :  { %577 = vmatpush.bf16.msra.mxu0 %v949_v30  ;;  %v992_v59 = vld [vmem:[%s1275_s1 + $0x158] sm:$0xff]  ;;  %v983_v62 = vld [vmem:[%s1275_s1 + $0x110] sm:$0xff]  ;;  %v982_v2 = vld [vmem:[%s1275_s1 + $0x108] sm:$0xff] }
  0x1f   :  { %590 = vmatpush.bf16.msra.mxu1 %v957_v31  ;;  %v1000_v60 = vld [vmem:[%s1275_s1 + $0x198] sm:$0xff]  ;;  %v991_v63 = vld [vmem:[%s1275_s1 + $0x150] sm:$0xff]  ;;  %v990_v3 = vld [vmem:[%s1275_s1 + $0x148] sm:$0xff] }
  0x20   :  { %603 = vmatpush.bf16.msra.mxu2 %v965_v34  ;;  %v1008_v61 = vld [vmem:[%s1275_s1 + $0x1d8] sm:$0xff]  ;;  %v999_v0 = vld [vmem:[%s1275_s1 + $0x190] sm:$0xff]  ;;  %v998_v5 = vld [vmem:[%s1275_s1 + $0x188] sm:$0xff] }
  0x21   :  { %616 = vmatpush.bf16.msra.mxu3 %v973_v35  ;;  %578 = vmatmul.bf16.vlgmr.msra.gmra.mxu0 %v170_v44  ;;  %v1007_v1 = vld [vmem:[%s1275_s1 + $0x1d0] sm:$0xff]  ;;  %v1006_v6 = vld [vmem:[%s1275_s1 + $0x1c8] sm:$0xff]  ;;  %v29_v7 = vld [vmem:[%s1274_s0 + $0x18] sm:$0xff] }
  0x22   :  { %622 = vmatpush.bf16.msrb.mxu0 %v988_v38  ;;  %591 = vmatmul.bf16.vlgmr.msra.gmra.mxu1 %v171_v45  ;;  %v28_v4 = vld [vmem:[%s1274_s0 + $0x10] sm:$0xff]  ;;  %v981_v10 = vld [vmem:[%s1275_s1 + $0x100] sm:$0xff]  ;;  %v168_v12 = vunpack.c.l.b16 %v29_v7  ;;  %v169_v13 = vunpack.c.h.b16 %v29_v7 }
  0x23   :  { %635 = vmatpush.bf16.msrb.mxu1 %v996_v39  ;;  %604 = vmatmul.bf16.vlgmr.msra.gmra.mxu2 %v172_v42  ;;  %v166_v8 = vunpack.c.l.b16 %v28_v4  ;;  %v167_v9 = vunpack.c.h.b16 %v28_v4  ;;  %v989_v11 = vld [vmem:[%s1275_s1 + $0x140] sm:$0xff] }
  0x24   :  { %648 = vmatpush.bf16.msrb.mxu2 %v1004_v40  ;;  %617 = vmatmul.bf16.vlgmr.msra.gmra.mxu3 %v173_v43  ;;  %v997_v14 = vld [vmem:[%s1275_s1 + $0x180] sm:$0xff]  ;;  %v176_v18 = vpack.c.b16 %v168_v12, %v168_v12  ;;  %v177_v19 = vpack.c.b16 %v169_v13, %v169_v13 }
  0x25   :  { %661 = vmatpush.bf16.msrb.mxu3 %v1012_v41  ;;  %v1005_v15 = vld [vmem:[%s1275_s1 + $0x1c0] sm:$0xff]  ;;  %v174_v16 = vpack.c.b16 %v166_v8, %v166_v8  ;;  %v175_v17 = vpack.c.b16 %v167_v9, %v167_v9  ;;  %s1041_s1 = smov [#allocation2]  }
  0x26   :  { %623 = vmatpush.bf16.msrb.mxu0 %v987_v46  ;;  %v1014_v20 = vld [vmem:[%s1276_s2] ss:$0 sm:$0xff]  ;;  %s682_s2 = sshll.u32 %s1041_s1, 4  ;;  %s683_s2 = int_to_ptr.vmem [resolvable:$true] %s682_s2 }
  0x27   :  { %636 = vmatpush.bf16.msrb.mxu1 %v995_v47  ;;  %24 = vst.msk [vmem:[#allocation2] sm:$0xff] %vm23_vm0, %v1014_v20 }
  0x28   :  { %649 = vmatpush.bf16.msrb.mxu2 %v1003_v48 }
  0x29   :  { %662 = vmatpush.bf16.msrb.mxu3 %v1011_v49 }
  0x2a   :  { %624 = vmatpush.bf16.msrb.mxu0 %v986_v50 }
  0x2b   :  { %637 = vmatpush.bf16.msrb.mxu1 %v994_v51 }
  0x2c   :  { %650 = vmatpush.bf16.msrb.mxu2 %v1002_v52 }
  0x2d   :  { %663 = vmatpush.bf16.msrb.mxu3 %v1010_v53 }
  0x2e   :  { %625 = vmatpush.bf16.msrb.mxu0 %v985_v54  ;;  %v25_v41 = vld [vmem:[#allocation2] sm:$0xff] }
  0x2f   :  { %638 = vmatpush.bf16.msrb.mxu1 %v993_v55 }
  0x30   :  { %651 = vmatpush.bf16.msrb.mxu2 %v1001_v56 }
  0x31   :  { %664 = vmatpush.bf16.msrb.mxu3 %v1009_v57 }
  0x32   :  { %626 = vmatpush.bf16.msrb.mxu0 %v984_v58 }
  0x33   :  { %639 = vmatpush.bf16.msrb.mxu1 %v992_v59 }
  0x34   :  { %652 = vmatpush.bf16.msrb.mxu2 %v1000_v60 }
  0x35   :  { %665 = vmatpush.bf16.msrb.mxu3 %v1008_v61 }
  0x36   :  { %627 = vmatpush.bf16.msrb.mxu0 %v983_v62 }
  0x37   :  { %640 = vmatpush.bf16.msrb.mxu1 %v991_v63 }
  0x38   :  { %653 = vmatpush.bf16.msrb.mxu2 %v999_v0 }
  0x39   :  { %666 = vmatpush.bf16.msrb.mxu3 %v1007_v1 }
  0x3a   :  { %628 = vmatpush.bf16.msrb.mxu0 %v982_v2 }
  0x3b   :  { %641 = vmatpush.bf16.msrb.mxu1 %v990_v3 }
  0x3c   :  { %654 = vmatpush.bf16.msrb.mxu2 %v998_v5 }
  0x3d   :  { %667 = vmatpush.bf16.msrb.mxu3 %v1006_v6 }
  0x3e   :  { %629 = vmatpush.bf16.msrb.mxu0 %v981_v10 }
  0x3f   :  { %642 = vmatpush.bf16.msrb.mxu1 %v989_v11 }
  0x40   :  { %655 = vmatpush.bf16.msrb.mxu2 %v997_v14 }
  0x41   :  { %668 = vmatpush.bf16.msrb.mxu3 %v1005_v15  ;;  %630 = vmatmul.bf16.vlgmr.msrb.gmra.mxu0 %v174_v16 }
  0x42   :  { %643 = vmatmul.bf16.vlgmr.msrb.gmra.mxu1 %v175_v17 }
  0x43   :  { %656 = vmatmul.bf16.vlgmr.msrb.gmra.mxu2 %v176_v18 }
  0x44   :  { %669 = vmatmul.bf16.vlgmr.msrb.gmra.mxu3 %v177_v19 }
  0x9e   :  { %v579_v21 = vpop.f32.mrf.mxu0 }
  0x9f   :  { %v592_v22 = vpop.f32.mrf.mxu1 }
  0xa0   :  { %v593_v29 = vadd.f32 %v592_v22, %v579_v21 }
  0xa6   :  { %v605_v23 = vpop.f32.mrf.mxu2  ;;  %v581_v25 = vpop.f32.mrf.mxu0 }
  0xa7   :  { %v618_v24 = vpop.f32.mrf.mxu3  ;;  %v594_v26 = vpop.f32.mrf.mxu1  ;;  %v606_v30 = vadd.f32 %v605_v23, %v593_v29 }
  0xa9   :  { %v619_v31 = vadd.f32 %v618_v24, %v606_v30 }
  0xae   :  { %v607_v27 = vpop.f32.mrf.mxu2 }
  0xaf   :  { %v620_v28 = vpop.f32.mrf.mxu3 }
  0xbe   :  { %v631_v32 = vpop.f32.mrf.mxu0 }
  0xbf   :  { %v644_v33 = vpop.f32.mrf.mxu1  ;;  %v632_v34 = vadd.f32 %v631_v32, %v619_v31 }
  0xc1   :  { %v645_v35 = vadd.f32 %v644_v33, %v632_v34 }
  0xc6   :  { %v657_v36 = vpop.f32.mrf.mxu2  ;;  %v633_v39 = vpop.f32.mrf.mxu0 }
  0xc7   :  { %v670_v37 = vpop.f32.mrf.mxu3  ;;  %v658_v38 = vadd.f32 %v657_v36, %v645_v35  ;;  %v646_v40 = vpop.f32.mrf.mxu1 }
  0xc9   :  { %v671_v42 = vadd.f32 %v670_v37, %v658_v38 }
  0xcb   :  { %v674_v43 = vadd.f32 %v671_v42, %v25_v41 }
  0xcd   :  { %676 = vst.msk [vmem:[#allocation2] sm:$0xff] %vm23_vm0, %v674_v43 }
  0xce   :  { %v659_v44 = vpop.f32.mrf.mxu2  ;;  %687 = dma.vmem_to_hbm [thread:$0]  %s683_s2, 128, %s685_s16, [#allocation3]  }
  0xcf   :  { %v672_v45 = vpop.f32.mrf.mxu3 }
  0xd0   :  { %1039 = dma.done.wait [#allocation3], 128  }
  0xd1   :  { %1040 = vsyncadd [#allocation3], 4294967168 }
  0xd2   :  { %692 = vsyncpa [#allocation3], 1 }

</bundles_post_ra>
